<compile_context>
chip_gen: v7x
topology: tpu7x:2x2x1
jax: 0.10.0
libtpu: 0.0.40
codegen_flags: <defaults>
</compile_context>

<pallas_src>
import functools

import jax
import jax.numpy as jnp
from jax.experimental import pallas as pl
from jax.experimental.pallas import tpu as pltpu


def _ctg_kernel(x_ref, w_ref, b_ref, a_ref, o_ref, a_bd_ref, mid_ref, *,
                Nb, C_in, C_out, T, V, Lp, graph_first):
    """One grid step = Nb batch samples.

    x_ref:    (Nb*C_in, Lp)    input rows of this batch block (lanes = padded T*V)
    w_ref:    (C_out, C_in)    1x1-conv weight
    b_ref:    (C_out, Lp) f32  graph-folded bias   [graph_first]
              (C_out, 1)  f32  plain conv bias     [otherwise]
    a_ref:    (T, V, V)        adjacency
    o_ref:    (Nb*C_out, Lp)   output rows of this batch block
    a_bd_ref: (Lp, Lp)         scratch: block-diagonal adjacency
    mid_ref:  (Nb*C_mid, Lp)   scratch: intermediate activations
    """
    # Expand A (T,V,V) into the block-diagonal adjacency in VMEM.  Rebuilt every
    # step: ~Lp^2 VMEM stores, negligible next to the matmuls, and stays correct
    # however the "parallel" grid axis gets sharded across TensorCores.
    a_bd_ref[...] = jnp.zeros_like(a_bd_ref)
    for t in range(T):
        a_bd_ref[pl.ds(t * V, V), pl.ds(t * V, V)] = a_ref[t].astype(a_bd_ref.dtype)

    w = w_ref[...]
    b = b_ref[...]
    a_bd = a_bd_ref[...]

    if graph_first:
        # Graph matmul with all Nb samples' C_in rows folded into one dot.
        g = jnp.dot(x_ref[...], a_bd, preferred_element_type=jnp.float32)
        mid_ref[...] = g.astype(mid_ref.dtype)
        # Per-sample channel mix (contraction is only C_in); bias was folded
        # through A in the wrapper (b_ref = bias (x) colsum(A)).
        for s in range(Nb):
            y = jnp.dot(w, mid_ref[pl.ds(s * C_in, C_in), :],
                        preferred_element_type=jnp.float32) + b
            o_ref[pl.ds(s * C_out, C_out), :] = y.astype(o_ref.dtype)
    else:
        # Per-sample channel mix (+ conv bias), then one graph matmul with
        # Nb*C_out rows folded together.
        for s in range(Nb):
            h = jnp.dot(w, x_ref[pl.ds(s * C_in, C_in), :],
                        preferred_element_type=jnp.float32) + b
            mid_ref[pl.ds(s * C_out, C_out), :] = h.astype(mid_ref.dtype)
        y = jnp.dot(mid_ref[...], a_bd, preferred_element_type=jnp.float32)
        o_ref[...] = y.astype(o_ref.dtype)


def _pick_batch_block(N, C_in, C_out):
    """Largest Nb <= 8 that divides N, keeps >= 2 grid blocks (v7x megacore),
    and keeps the (Nb*C, Lp) BlockSpec rows 8-divisible; otherwise one block."""
    if N <= 1:
        return 1
    for nb in range(min(8, N // 2), 0, -1):
        if N % nb == 0 and (nb * C_in) % 8 == 0 and (nb * C_out) % 8 == 0:
            return nb
    return N


def conv_temporal_graphical(x, A, weight, bias, *, compute_dtype=None):
    """x: (N, C_in, T, V); A: (T, V, V); weight: (C_out, C_in, 1, 1); bias: (C_out,)."""
    N, C_in, T, V = x.shape
    C_out = weight.shape[0]
    assert A.shape == (T, V, V), "A.shape[0] must equal kernel_size (== T here)"
    # TODO(synk): only the default temporal conv (t_kernel_size=1, stride=1,
    # padding=0, dilation=1) is implemented; general temporal taps would need
    # halo fetching along T.
    assert weight.shape[1:] == (C_in, 1, 1)

    cdt = jnp.dtype(compute_dtype) if compute_dtype is not None else x.dtype

    L = T * V
    Lp = max(128, ((L + 127) // 128) * 128)     # lane-dense output stores
    graph_first = C_in <= C_out                 # L x L contraction on fewer rows

    # Native-layout, free reshape (N, C_in, T, V) -> (N*C_in, L); pad lanes only
    # if T*V is not already a multiple of 128.
    x2d = x.reshape(N * C_in, L)
    if Lp != L:
        x2d = jnp.pad(x2d, ((0, 0), (0, Lp - L)))
    w2d = weight.reshape(C_out, C_in)

    if graph_first:
        # (W x + b 1^T) A_bd == W (x A_bd) + b (x) colsum(A): bias folded through A.
        colsum = jnp.sum(A, axis=1).reshape(L).astype(jnp.float32)
        if Lp != L:
            colsum = jnp.pad(colsum, (0, Lp - L))
        bias_op = bias.astype(jnp.float32)[:, None] * colsum[None, :]   # (C_out, Lp)
    else:
        bias_op = bias.astype(jnp.float32).reshape(C_out, 1)

    Nb = _pick_batch_block(N, C_in, C_out)
    grid = (N // Nb,)
    C_mid = C_in if graph_first else C_out

    kernel = functools.partial(
        _ctg_kernel, Nb=Nb, C_in=C_in, C_out=C_out, T=T, V=V, Lp=Lp,
        graph_first=graph_first)

    out2d = pl.pallas_call(
        kernel,
        out_shape=jax.ShapeDtypeStruct((N * C_out, Lp), x.dtype),
        grid_spec=pltpu.PrefetchScalarGridSpec(
            num_scalar_prefetch=0,
            grid=grid,
            in_specs=[
                pl.BlockSpec((Nb * C_in, Lp), lambda n: (n, 0)),
                pl.BlockSpec((C_out, C_in), lambda n: (0, 0)),
                pl.BlockSpec(bias_op.shape, lambda n: (0, 0)),
                pl.BlockSpec((T, V, V), lambda n: (0, 0, 0)),
            ],
            out_specs=pl.BlockSpec((Nb * C_out, Lp), lambda n: (n, 0)),
            scratch_shapes=[
                pltpu.VMEM((Lp, Lp), cdt),           # block-diagonal adjacency
                pltpu.VMEM((Nb * C_mid, Lp), cdt),   # intermediate activations
            ],
        ),
        compiler_params=pltpu.CompilerParams(
            dimension_semantics=("parallel",)),
    )(x2d.astype(cdt), w2d.astype(cdt), bias_op, A.astype(cdt))

    out2d = out2d[:, :L] if Lp != L else out2d
    return out2d.reshape(N, C_out, T, V), A


if __name__ == "__main__":
    key = jax.random.PRNGKey(0)
    kx, ka, kw, kb = jax.random.split(key, 4)

    # Small shapes consistent with the module: N batch, C channels, T time, V nodes.
    N, C_in, C_out, T, V = 8, 4, 16, 8, 16
    x = jax.random.normal(kx, (N, C_in, T, V), dtype=jnp.float32)
    A = jax.random.normal(ka, (T, V, V), dtype=jnp.float32)

    # Deterministic synthetic parameters (Conv2d weight shape: (C_out, C_in, 1, 1)).
    weight = 0.1 * jax.random.normal(kw, (C_out, C_in, 1, 1), dtype=jnp.float32)
    bias = 0.1 * jax.random.normal(kb, (C_out,), dtype=jnp.float32)

    out, A_out = conv_temporal_graphical(x, A, weight, bias)
    out = jax.block_until_ready(out)

    # Pure-JAX reference of the PyTorch forward.
    h_ref = jnp.einsum('oi,nitv->notv', weight.reshape(C_out, C_in), x,
                       precision=jax.lax.Precision.HIGHEST) \
        + bias[None, :, None, None]
    ref = jnp.einsum('nctv,tvw->nctw', h_ref, A,
                     precision=jax.lax.Precision.HIGHEST)

    assert out.shape == (N, C_out, T, V)
    assert A_out.shape == (T, V, V)
    assert jnp.allclose(out, ref, atol=1e-3, rtol=1e-3), "mismatch vs reference"
    print("KERNEL_OK")
</pallas_src>

<mosaic_0001>
module attributes {stable_mosaic.version = 11 : i64} {
  func.func @_ctg_kernel(%arg0: i32, %arg1: memref<16x128xf32, #tpu.memory_space<vmem>>, %arg2: memref<16x4xf32, #tpu.memory_space<vmem>>, %arg3: memref<16x128xf32, #tpu.memory_space<vmem>>, %arg4: memref<8x16x16xf32, #tpu.memory_space<vmem>>, %arg5: memref<64x128xf32, #tpu.memory_space<vmem>>, %arg6: memref<128x128xf32, #tpu.memory_space<vmem>>, %arg7: memref<16x128xf32, #tpu.memory_space<vmem>>) attributes {dimension_semantics = [#tpu.dimension_semantics<parallel>], iteration_bounds = array<i64: 2>, scalar_prefetch = 0 : i64, scratch_operands = 2 : i64, tpu.core_type = #tpu.core_type<tc>, window_params = [{transform_indices = @transform_0, window_bounds = array<i64: 16, 128>}, {pipeline_mode = #tpu.pipeline_mode<synchronous>, transform_indices = @transform_1, window_bounds = array<i64: 16, 4>}, {pipeline_mode = #tpu.pipeline_mode<synchronous>, transform_indices = @transform_2, window_bounds = array<i64: 16, 128>}, {pipeline_mode = #tpu.pipeline_mode<synchronous>, transform_indices = @transform_3, window_bounds = array<i64: 8, 16, 16>}, {transform_indices = @transform_4, window_bounds = array<i64: 64, 128>}]} {
    %cst = arith.constant 0.000000e+00 : f32
    %0 = vector.broadcast %cst : f32 to vector<128x128xf32>
    %c0 = arith.constant 0 : index
    %c0_0 = arith.constant 0 : index
    %1 = vector.load %arg6[%c0, %c0_0] : memref<128x128xf32, #tpu.memory_space<vmem>>, vector<128x128xf32>
    tpu.vector_store %arg6[%c0, %c0_0], %0 {strides = array<i32>} : memref<128x128xf32, #tpu.memory_space<vmem>>, vector<128x128xf32>,
    %c0_1 = arith.constant 0 : index
    %c0_2 = arith.constant 0 : index
    %c0_3 = arith.constant 0 : index
    %2 = vector.load %arg4[%c0_1, %c0_2, %c0_3] : memref<8x16x16xf32, #tpu.memory_space<vmem>>, vector<1x16x16xf32>
    %3 = vector.shape_cast %2 : vector<1x16x16xf32> to vector<16x16xf32>
    %c0_4 = arith.constant 0 : index
    %c0_5 = arith.constant 0 : index
    %4 = vector.load %arg6[%c0_4, %c0_5] : memref<128x128xf32, #tpu.memory_space<vmem>>, vector<16x16xf32>
    tpu.vector_store %arg6[%c0_4, %c0_5], %3 {strides = array<i32>} : memref<128x128xf32, #tpu.memory_space<vmem>>, vector<16x16xf32>,
    %c1 = arith.constant 1 : index
    %c0_6 = arith.constant 0 : index
    %c0_7 = arith.constant 0 : index
    %5 = vector.load %arg4[%c1, %c0_6, %c0_7] : memref<8x16x16xf32, #tpu.memory_space<vmem>>, vector<1x16x16xf32>
    %6 = vector.shape_cast %5 : vector<1x16x16xf32> to vector<16x16xf32>
    %c16 = arith.constant 16 : index
    %c16_8 = arith.constant 16 : index
    %7 = vector.load %arg6[%c16, %c16_8] : memref<128x128xf32, #tpu.memory_space<vmem>>, vector<16x16xf32>
    tpu.vector_store %arg6[%c16, %c16_8], %6 {strides = array<i32>} : memref<128x128xf32, #tpu.memory_space<vmem>>, vector<16x16xf32>,
    %c2 = arith.constant 2 : index
    %c0_9 = arith.constant 0 : index
    %c0_10 = arith.constant 0 : index
    %8 = vector.load %arg4[%c2, %c0_9, %c0_10] : memref<8x16x16xf32, #tpu.memory_space<vmem>>, vector<1x16x16xf32>
    %9 = vector.shape_cast %8 : vector<1x16x16xf32> to vector<16x16xf32>
    %c32 = arith.constant 32 : index
    %c32_11 = arith.constant 32 : index
    %10 = vector.load %arg6[%c32, %c32_11] : memref<128x128xf32, #tpu.memory_space<vmem>>, vector<16x16xf32>
    tpu.vector_store %arg6[%c32, %c32_11], %9 {strides = array<i32>} : memref<128x128xf32, #tpu.memory_space<vmem>>, vector<16x16xf32>,
    %c3 = arith.constant 3 : index
    %c0_12 = arith.constant 0 : index
    %c0_13 = arith.constant 0 : index
    %11 = vector.load %arg4[%c3, %c0_12, %c0_13] : memref<8x16x16xf32, #tpu.memory_space<vmem>>, vector<1x16x16xf32>
    %12 = vector.shape_cast %11 : vector<1x16x16xf32> to vector<16x16xf32>
    %c48 = arith.constant 48 : index
    %c48_14 = arith.constant 48 : index
    %13 = vector.load %arg6[%c48, %c48_14] : memref<128x128xf32, #tpu.memory_space<vmem>>, vector<16x16xf32>
    tpu.vector_store %arg6[%c48, %c48_14], %12 {strides = array<i32>} : memref<128x128xf32, #tpu.memory_space<vmem>>, vector<16x16xf32>,
    %c4 = arith.constant 4 : index
    %c0_15 = arith.constant 0 : index
    %c0_16 = arith.constant 0 : index
    %14 = vector.load %arg4[%c4, %c0_15, %c0_16] : memref<8x16x16xf32, #tpu.memory_space<vmem>>, vector<1x16x16xf32>
    %15 = vector.shape_cast %14 : vector<1x16x16xf32> to vector<16x16xf32>
    %c64 = arith.constant 64 : index
    %c64_17 = arith.constant 64 : index
    %16 = vector.load %arg6[%c64, %c64_17] : memref<128x128xf32, #tpu.memory_space<vmem>>, vector<16x16xf32>
    tpu.vector_store %arg6[%c64, %c64_17], %15 {strides = array<i32>} : memref<128x128xf32, #tpu.memory_space<vmem>>, vector<16x16xf32>,
    %c5 = arith.constant 5 : index
    %c0_18 = arith.constant 0 : index
    %c0_19 = arith.constant 0 : index
    %17 = vector.load %arg4[%c5, %c0_18, %c0_19] : memref<8x16x16xf32, #tpu.memory_space<vmem>>, vector<1x16x16xf32>
    %18 = vector.shape_cast %17 : vector<1x16x16xf32> to vector<16x16xf32>
    %c80 = arith.constant 80 : index
    %c80_20 = arith.constant 80 : index
    %19 = vector.load %arg6[%c80, %c80_20] : memref<128x128xf32, #tpu.memory_space<vmem>>, vector<16x16xf32>
    tpu.vector_store %arg6[%c80, %c80_20], %18 {strides = array<i32>} : memref<128x128xf32, #tpu.memory_space<vmem>>, vector<16x16xf32>,
    %c6 = arith.constant 6 : index
    %c0_21 = arith.constant 0 : index
    %c0_22 = arith.constant 0 : index
    %20 = vector.load %arg4[%c6, %c0_21, %c0_22] : memref<8x16x16xf32, #tpu.memory_space<vmem>>, vector<1x16x16xf32>
    %21 = vector.shape_cast %20 : vector<1x16x16xf32> to vector<16x16xf32>
    %c96 = arith.constant 96 : index
    %c96_23 = arith.constant 96 : index
    %22 = vector.load %arg6[%c96, %c96_23] : memref<128x128xf32, #tpu.memory_space<vmem>>, vector<16x16xf32>
    tpu.vector_store %arg6[%c96, %c96_23], %21 {strides = array<i32>} : memref<128x128xf32, #tpu.memory_space<vmem>>, vector<16x16xf32>,
    %c7 = arith.constant 7 : index
    %c0_24 = arith.constant 0 : index
    %c0_25 = arith.constant 0 : index
    %23 = vector.load %arg4[%c7, %c0_24, %c0_25] : memref<8x16x16xf32, #tpu.memory_space<vmem>>, vector<1x16x16xf32>
    %24 = vector.shape_cast %23 : vector<1x16x16xf32> to vector<16x16xf32>
    %c112 = arith.constant 112 : index
    %c112_26 = arith.constant 112 : index
    %25 = vector.load %arg6[%c112, %c112_26] : memref<128x128xf32, #tpu.memory_space<vmem>>, vector<16x16xf32>
    tpu.vector_store %arg6[%c112, %c112_26], %24 {strides = array<i32>} : memref<128x128xf32, #tpu.memory_space<vmem>>, vector<16x16xf32>,
    %c0_27 = arith.constant 0 : index
    %c0_28 = arith.constant 0 : index
    %26 = vector.load %arg2[%c0_27, %c0_28] : memref<16x4xf32, #tpu.memory_space<vmem>>, vector<16x4xf32>
    %c0_29 = arith.constant 0 : index
    %c0_30 = arith.constant 0 : index
    %27 = vector.load %arg3[%c0_29, %c0_30] : memref<16x128xf32, #tpu.memory_space<vmem>>, vector<16x128xf32>
    %c0_31 = arith.constant 0 : index
    %c0_32 = arith.constant 0 : index
    %28 = vector.load %arg6[%c0_31, %c0_32] : memref<128x128xf32, #tpu.memory_space<vmem>>, vector<128x128xf32>
    %c0_33 = arith.constant 0 : index
    %c0_34 = arith.constant 0 : index
    %29 = vector.load %arg1[%c0_33, %c0_34] : memref<16x128xf32, #tpu.memory_space<vmem>>, vector<16x128xf32>
    %cst_35 = arith.constant dense<0.000000e+00> : vector<16x128xf32>
    %30 = tpu.matmul %29, %28, %cst_35 {dimension_numbers = #tpu.dot_dimension_numbers<[1], [0], [0], [1], [0, 0, 1, 1], [], []>} : vector<16x128xf32>, vector<128x128xf32>, vector<16x128xf32> -> vector<16x128xf32>
    %c0_36 = arith.constant 0 : index
    %c0_37 = arith.constant 0 : index
    %31 = vector.load %arg7[%c0_36, %c0_37] : memref<16x128xf32, #tpu.memory_space<vmem>>, vector<16x128xf32>
    tpu.vector_store %arg7[%c0_36, %c0_37], %30 {strides = array<i32>} : memref<16x128xf32, #tpu.memory_space<vmem>>, vector<16x128xf32>,
    %c0_38 = arith.constant 0 : index
    %c0_39 = arith.constant 0 : index
    %32 = vector.load %arg7[%c0_38, %c0_39] : memref<16x128xf32, #tpu.memory_space<vmem>>, vector<4x128xf32>
    %cst_40 = arith.constant dense<0.000000e+00> : vector<16x128xf32>
    %33 = tpu.matmul %26, %32, %cst_40 {dimension_numbers = #tpu.dot_dimension_numbers<[1], [0], [0], [1], [0, 0, 1, 1], [], []>} : vector<16x4xf32>, vector<4x128xf32>, vector<16x128xf32> -> vector<16x128xf32>
    %34 = arith.addf %33, %27 : vector<16x128xf32>
    %c0_41 = arith.constant 0 : index
    %c0_42 = arith.constant 0 : index
    %35 = vector.load %arg5[%c0_41, %c0_42] : memref<64x128xf32, #tpu.memory_space<vmem>>, vector<16x128xf32>
    tpu.vector_store %arg5[%c0_41, %c0_42], %34 {strides = array<i32>} : memref<64x128xf32, #tpu.memory_space<vmem>>, vector<16x128xf32>,
    %c4_43 = arith.constant 4 : index
    %c0_44 = arith.constant 0 : index
    %36 = vector.load %arg7[%c4_43, %c0_44] : memref<16x128xf32, #tpu.memory_space<vmem>>, vector<4x128xf32>
    %cst_45 = arith.constant dense<0.000000e+00> : vector<16x128xf32>
    %37 = tpu.matmul %26, %36, %cst_45 {dimension_numbers = #tpu.dot_dimension_numbers<[1], [0], [0], [1], [0, 0, 1, 1], [], []>} : vector<16x4xf32>, vector<4x128xf32>, vector<16x128xf32> -> vector<16x128xf32>
    %38 = arith.addf %37, %27 : vector<16x128xf32>
    %c16_46 = arith.constant 16 : index
    %c0_47 = arith.constant 0 : index
    %39 = vector.load %arg5[%c16_46, %c0_47] : memref<64x128xf32, #tpu.memory_space<vmem>>, vector<16x128xf32>
    tpu.vector_store %arg5[%c16_46, %c0_47], %38 {strides = array<i32>} : memref<64x128xf32, #tpu.memory_space<vmem>>, vector<16x128xf32>,
    %c8 = arith.constant 8 : index
    %c0_48 = arith.constant 0 : index
    %40 = vector.load %arg7[%c8, %c0_48] : memref<16x128xf32, #tpu.memory_space<vmem>>, vector<4x128xf32>
    %cst_49 = arith.constant dense<0.000000e+00> : vector<16x128xf32>
    %41 = tpu.matmul %26, %40, %cst_49 {dimension_numbers = #tpu.dot_dimension_numbers<[1], [0], [0], [1], [0, 0, 1, 1], [], []>} : vector<16x4xf32>, vector<4x128xf32>, vector<16x128xf32> -> vector<16x128xf32>
    %42 = arith.addf %41, %27 : vector<16x128xf32>
    %c32_50 = arith.constant 32 : index
    %c0_51 = arith.constant 0 : index
    %43 = vector.load %arg5[%c32_50, %c0_51] : memref<64x128xf32, #tpu.memory_space<vmem>>, vector<16x128xf32>
    tpu.vector_store %arg5[%c32_50, %c0_51], %42 {strides = array<i32>} : memref<64x128xf32, #tpu.memory_space<vmem>>, vector<16x128xf32>,
    %c12 = arith.constant 12 : index
    %c0_52 = arith.constant 0 : index
    %44 = vector.load %arg7[%c12, %c0_52] : memref<16x128xf32, #tpu.memory_space<vmem>>, vector<4x128xf32>
    %cst_53 = arith.constant dense<0.000000e+00> : vector<16x128xf32>
    %45 = tpu.matmul %26, %44, %cst_53 {dimension_numbers = #tpu.dot_dimension_numbers<[1], [0], [0], [1], [0, 0, 1, 1], [], []>} : vector<16x4xf32>, vector<4x128xf32>, vector<16x128xf32> -> vector<16x128xf32>
    %46 = arith.addf %45, %27 : vector<16x128xf32>
    %c48_54 = arith.constant 48 : index
    %c0_55 = arith.constant 0 : index
    %47 = vector.load %arg5[%c48_54, %c0_55] : memref<64x128xf32, #tpu.memory_space<vmem>>, vector<16x128xf32>
    tpu.vector_store %arg5[%c48_54, %c0_55], %46 {strides = array<i32>} : memref<64x128xf32, #tpu.memory_space<vmem>>, vector<16x128xf32>,
    return
  }
  func.func @transform_0(%arg0: i32) -> (i32, i32) {
    %c0_i32 = arith.constant 0 : i32
    %c0_i32_0 = arith.constant 0 : i32
    return %arg0, %c0_i32 : i32, i32
  }
  func.func @transform_1(%arg0: i32) -> (i32, i32) {
    %c0_i32 = arith.constant 0 : i32
    %c0_i32_0 = arith.constant 0 : i32
    %c0_i32_1 = arith.constant 0 : i32
    return %c0_i32, %c0_i32_0 : i32, i32
  }
  func.func @transform_2(%arg0: i32) -> (i32, i32) {
    %c0_i32 = arith.constant 0 : i32
    %c0_i32_0 = arith.constant 0 : i32
    %c0_i32_1 = arith.constant 0 : i32
    return %c0_i32, %c0_i32_0 : i32, i32
  }
  func.func @transform_3(%arg0: i32) -> (i32, i32, i32) {
    %c0_i32 = arith.constant 0 : i32
    %c0_i32_0 = arith.constant 0 : i32
    %c0_i32_1 = arith.constant 0 : i32
    %c0_i32_2 = arith.constant 0 : i32
    return %c0_i32, %c0_i32_0, %c0_i32_1 : i32, i32, i32
  }
  func.func @transform_4(%arg0: i32) -> (i32, i32) {
    %c0_i32 = arith.constant 0 : i32
    %c0_i32_0 = arith.constant 0 : i32
    return %arg0, %c0_i32 : i32, i32
  }
}

</mosaic_0001>

<bundles_post_ra>
// kernel: tpu_custom_call.1
= control target key start
LH: loop header
LB: loop body
LE: loop exit
PB: predicated region body
PF: predicated region fallthrough
CT: control target
= control target key end

     0   :  { %9 = vsyncpa [#allocation5], 0  ;;  %s1506_s0 = inlined_call_operand.hbm [shape: f32[32,128], index: 0, kind: input, shape index: {}]   ;;  %s1507_s1 = inlined_call_operand.vmem [shape: f32[16,4], index: 1, kind: input, shape index: {}]   ;;  %s1508_s2 = inlined_call_operand.vmem [shape: f32[16,128], index: 2, kind: input, shape index: {}]   ;;  %s1509_s3 = inlined_call_operand.hbm [shape: f32[8,16,16], index: 3, kind: input, shape index: {}]   ;;  %s1510_s4 = inlined_call_operand.hbm [shape: f32[128,128], index: 4, kind: output, shape index: {}]  }
   0x1   :  { %11 = vsyncpa [#allocation5 + $0x1], 0 }
   0x2   :  { %12 = vsyncpa [#allocation8], 0 }
   0x3   :  { %13 = vsyncpa [#allocation6], 0 }
   0x4   :  { %15 = vsyncpa [#allocation6 + $0x1], 0  ;;  %s1266_s15 = smov 0   ;;  %s1268_s16 = smov 0  }
   0x5   :  { %s1270_s17 = smov 0   ;;  %s1272_s18 = smov 0  }
   0x6 LB: > { %s1287_s19 = sadd.s32 4294967295, %s1224_s18   ;;  %s880_s20 = sadd.s32 4294967294, %s1224_s18   ;;  %s1224_s18 = sphi %s1272_s18, %s1530_s18   ;;  %s1220_s17 = sphi %s1270_s17, %s1529_s17   ;;  %s1216_s16 = sphi %s1268_s16, %s1528_s16   ;;  %s1212_s15 = sphi %s1266_s15, %s1527_s15  }
   0x7   : > { %p41_p0 = scmp.ne.s32.totalorder %s1216_s16, %s1212_s15  ;;  %p1511_p1 = scmp.eq.s32.totalorder %s1287_s19, 0 }
   0x8   : > { %p134_p3 = scmp.eq.s32.totalorder %s880_s20, 1  ;;  %p881_p5 = scmp.ge.s32.totalorder %s1224_s18, 1 }
   0x9   : > { %p1296_p4 = por %p1511_p1, %p41_p0  ;;  %p141_p7 = scmp.lt.s32.totalorder %s1224_s18, 3 }
   0xa   : > { %p1301_p6 = por %p134_p3, %p41_p0  ;;  %s1226_s24 = smov [#allocation7]  }
   0xb   : > { %s1514_s21 = scalar_select %p1296_p4, 1, 0 }
   0xc   : > { %s1515_s22 = scalar_select %p1301_p6, 1, 0 }
   0xd   : > { %p1306_p8 = pnand %p881_p5, %p141_p7  ;;  %s159_s25 = sshll.u32 %s1226_s24, 4  ;;  %s1310_s25 = int_to_ptr.vmem [resolvable:$true] %s159_s25 }
   0xe   : > { %s1322_s27 = sadd.s32 1, %s1224_s18   ;;  %s28_s28 = sadd.s32 1, %s1220_s17 }
   0xf   : > { %s1516_s23 = scalar_select %p1306_p8, 1, 0 }
  0x10   : > { %p1035_p9 = pneg %p1306_p8  ;;  %s25_s29 = ssub.s32 %s1224_s18, %s1322_s27 }
  0x11   : > { %s1096_s6 = scalar_lea.hbm %s1509_s3, 2048 }
  0x12   : > { %p1317_p11 = pnand %p1035_p9, %p1511_p1  ;;  %p1097_p12 = scmp.ne.s32.totalorder %s1509_s3, %s1096_s6 }
  0x13   : > { %p1103_p5 = scmp.lt.u32.totalorder %s1096_s6, %s1509_s3 }
  0x14   : > { %p1098_p13 = pneg %p1317_p11 }
  0x16   : > { %p1099_p0 = pnand %p1098_p13, %p1097_p12 }
  0x18   : > { %p1100_p3 = pneg %p1099_p0 }
  0x1a   : > { %p1105_p7 = pnand %p1103_p5, %p1100_p3 }
  0x1c   : > { %1108 = shalt.err (!%p1105_p7)
}
  0x1d   : > { %s1109_s11 = scalar_lea.vmem %s1310_s25, 2048  ;;  %p1117_p2 = scmp.lt.s32.totalorder %s1310_s25, %s1310_s25 }
  0x1e   : > { %p1110_p9 = scmp.ne.s32.totalorder %s1310_s25, %s1109_s11  ;;  %p1118_p6 = scmp.lt.s32.totalorder %s1109_s11, %s1109_s11 }
  0x20   : > { %p1112_p10 = pnand %p1110_p9, %p1098_p13  ;;  %p1119_p4 = por %p1118_p6, %p1117_p2 }
  0x22   : > { %p1113_p1 = pneg %p1112_p10 }
  0x24   : > { %p1120_p8 = pnand %p1119_p4, %p1113_p1 }
  0x26   : > { %1123 = shalt.err (!%p1120_p8)
}
  0x27   : > { %s1227_s12 = smov 128   ;;  %s1228_s13 = smov 8  }
  0x28   : > { %1038 = dma.hbm_to_vmem [thread:$0]  (!%p1317_p11), %s1509_s3, 2048, %s1310_s25, [#allocation8], %s1227_s12, %s1227_s12, %s1228_s13  }
  0x29   : > { %p26_p1 = scmp.eq.s32.totalorder %s25_s29, 0  ;;  %p35_p2 = scmp.ne.s32.totalorder %s1220_s17, %s1216_s16 }
  0x2a   : > { %p36_p4 = scmp.eq.s32.totalorder %s1224_s18, 0  ;;  %p1048_p6 = scmp.lt.s32.totalorder %s1224_s18, 2 }
  0x2b   : > { %s1356_s24 = scalar_select %p26_p1, %s1220_s17, %s28_s28  }
  0x2c   : > { %p37_p8 = por %p36_p4, %p35_p2  ;;  %p1518_p10 = scmp.eq.s32.totalorder %s1287_s19, 1 }
  0x2d   : > { %s173_s26 = sand.u32 1, %s1220_s17   ;;  %s908_s5 = sshll.u32 %s1224_s18, 8 }
  0x2e   : > { %p1360_p12 = por %p1518_p10, %p35_p2  ;;  %s884_s6 = sshll.u32 %s173_s26, 4 }
  0x2f   : > { %s1369_s9 = scalar_lea.hbm %s1506_s0, %s908_s5  ;;  %s177_s25 = scalar_lea.vmem [#allocation4], %s884_s6 }
  0x30   : > { %s184_s28 = sshll.u32 %s177_s25, 4  ;;  %p1371_p11 = pnand %p1048_p6, %p37_p8  ;;  %s1375_s28 = int_to_ptr.vmem [resolvable:$true] %s184_s28 }
  0x31   : > { %s1377_s10 = scalar_lea.sflag [#allocation5], %s173_s26  ;;  %s1124_s11 = scalar_lea.hbm %s1369_s9, 256 }
  0x32   : > { %p1125_p13 = scmp.ne.s32.totalorder %s1369_s9, %s1124_s11  ;;  %p1126_p0 = pneg %p1371_p11 }
  0x33   : > { %s1129_s5 = scalar_lea.hbm %s1506_s0, 512  ;;  %p1130_p7 = scmp.lt.u32.totalorder %s1369_s9, %s1506_s0 }
  0x34   : > { %p1127_p3 = pnand %p1126_p0, %p1125_p13  ;;  %p1131_p9 = scmp.lt.u32.totalorder %s1129_s5, %s1124_s11 }
  0x35   : > { %p1133_p2 = scmp.lt.u32.totalorder %s1124_s11, %s1369_s9 }
  0x36   : > { %p1128_p5 = pneg %p1127_p3  ;;  %p1132_p1 = por %p1131_p9, %p1130_p7 }
  0x38   : > { %p1134_p4 = por %p1133_p2, %p1132_p1 }
  0x3a   : > { %p1135_p6 = pnand %p1134_p4, %p1128_p5 }
  0x3c   : > { %1138 = shalt.err (!%p1135_p6)
}
  0x3d   : > { %s1139_s26 = scalar_lea.vmem %s1375_s28, 256  ;;  %s1229_s8 = smov [#allocation4]  }
  0x3e   : > { %p1140_p8 = scmp.ne.s32.totalorder %s1375_s28, %s1139_s26  ;;  %s1144_s25 = sshll.u32 %s1229_s8, 4  ;;  %s1145_s25 = int_to_ptr.vmem [resolvable:$false] %s1144_s25 }
  0x3f   : > { %s1146_s14 = scalar_lea.vmem %s1145_s25, 512  ;;  %p1147_p3 = scmp.lt.s32.totalorder %s1375_s28, %s1145_s25 }
  0x40   : > { %p1142_p10 = pnand %p1140_p8, %p1126_p0  ;;  %p1148_p7 = scmp.lt.s32.totalorder %s1146_s14, %s1139_s26 }
  0x42   : > { %p1143_p13 = pneg %p1142_p10  ;;  %p1149_p9 = por %p1148_p7, %p1147_p3 }
  0x44   : > { %p1150_p1 = pnand %p1149_p9, %p1143_p13 }
  0x46   : > { %1153 = shalt.err (!%p1150_p1)
}
  0x47   : > { %1042 = dma.hbm_to_vmem [thread:$0]  (!%p1371_p11), %s1369_s9, 256, %s1375_s28, %s1377_s10, %s1227_s12, %s1227_s12, %s1228_s13  }
  0x48   : > { %p1521_p0 = scmp.ne.s32.totalorder %s1516_s23, 0 }
  0x49   : > { %s1411_s11 = sand.u32 (!%p1521_p0), 1, %s1216_s16   ;;  %p1522_p5 = scmp.ne.s32.totalorder (!%p1521_p0), %s1514_s21, 0 }
  0x4a   : > { %196 = sbr.rel (%p1521_p0) target bundleno = 709 (0x2c5), region = 36  ;;  %s888_s20 = sshll.u32 (!%p1521_p0), %s1411_s11, 4 }
  0x4b   : > { %s199_s5 = scalar_lea.sflag (!%p1521_p0), [#allocation5], %s1411_s11  ;;  %s1415_s6 = scalar_lea.vmem (!%p1521_p0), [#allocation4], %s888_s20 }
  0x51   : > { %1199 = dma.done.wait (%p1522_p5), %s199_s5, 256  }
  0x52   : > { %1201 = vsyncadd (%p1522_p5), %s199_s5, 4294967040  ;;  %p1523_p11 = scmp.eq.s32.totalorder %s1287_s19, 0 }
  0x54   : > { %1203 = dma.done.wait (%p1523_p11), [#allocation8], 2048   ;;  %p1524_p2 = pmov %p1523_p11 }
  0x55   : > { %v1230_v0 = vmov 0.0   ;;  %v269_v1 = vld [vmem:[#allocation7 + $0x20] sm:$0xff]  ;;  %v255_v2 = vld [vmem:[#allocation7 + $0x10] sm:$0xff]  ;;  %s1231_s21 = smov 32   ;;  %s1232_s23 = smov 16   ;;  %v270_v3 = vld [vmem:[#allocation7 + $0x28] sm:$0xff] }
  0x56   : > { %1205 = vsyncadd (%p1524_p2), [#allocation8], 4294965248  ;;  %237 = vst [vmem:[#allocation2 + $0x20] sm:$0xff] %v1230_v0  ;;  %273 = vrot.lane.b32.xlu1 %v269_v1, %s1231_s21  ;;  %259 = vrot.lane.b32.xlu0 %v255_v2, %s1232_s23  ;;  %v256_v4 = vld [vmem:[#allocation7 + $0x18] sm:$0xff]  ;;  %vm251_vm0 = vcmask 130048   ;;  %v249_v5 = vld [vmem:[#allocation7] sm:$0xff] }
  0x57   : > { %233 = vst [vmem:[#allocation2] sm:$0xff] %v1230_v0  ;;  %234 = vst [vmem:[#allocation2 + $0x8] sm:$0xff] %v1230_v0  ;;  %v250_v6 = vld [vmem:[#allocation7 + $0x8] sm:$0xff]  ;;  %v284_v7 = vld [vmem:[#allocation7 + $0x38] sm:$0xff]  ;;  %s1233_s12 = smov 48   ;;  %s1234_s13 = smov 64  }
  0x58   : > { %235 = vst [vmem:[#allocation2 + $0x10] sm:$0xff] %v1230_v0  ;;  %236 = vst [vmem:[#allocation2 + $0x18] sm:$0xff] %v1230_v0  ;;  %v283_v8 = vld [vmem:[#allocation7 + $0x30] sm:$0xff]  ;;  %v298_v9 = vld [vmem:[#allocation7 + $0x48] sm:$0xff]  ;;  %s1235_s9 = smov 80   ;;  %s1236_s28 = smov 96  }
  0x59   : > { %238 = vst [vmem:[#allocation2 + $0x28] sm:$0xff] %v1230_v0  ;;  %239 = vst [vmem:[#allocation2 + $0x30] sm:$0xff] %v1230_v0  ;;  %v297_v10 = vld [vmem:[#allocation7 + $0x40] sm:$0xff]  ;;  %v312_v13 = vld [vmem:[#allocation7 + $0x58] sm:$0xff]  ;;  %s1237_s29 = smov 112   ;;  %vm279_vm1 = vcmask 392448  }
  0x5a   : > { %240 = vst [vmem:[#allocation2 + $0x38] sm:$0xff] %v1230_v0  ;;  %241 = vst [vmem:[#allocation2 + $0x40] sm:$0xff] %v1230_v0  ;;  %275 = vrot.lane.b32.xlu1 %v270_v3, %s1231_s21  ;;  %261 = vrot.lane.b32.xlu0 %v256_v4, %s1232_s23  ;;  %v311_v14 = vld [vmem:[#allocation7 + $0x50] sm:$0xff]  ;;  %v326_v16 = vld [vmem:[#allocation7 + $0x68] sm:$0xff]  ;;  %vm265_vm2 = vcmask 261248   ;;  %vm293_vm3 = vcmask 523648  }
  0x5b   : > { %242 = vst [vmem:[#allocation2 + $0x48] sm:$0xff] %v1230_v0  ;;  %243 = vst [vmem:[#allocation2 + $0x50] sm:$0xff] %v1230_v0  ;;  %v325_v17 = vld [vmem:[#allocation7 + $0x60] sm:$0xff]  ;;  %v340_v18 = vld [vmem:[#allocation7 + $0x78] sm:$0xff]  ;;  %vm307_vm4 = vcmask 654848   ;;  %vm321_vm5 = vcmask 786048  }
  0x5c   : > { %244 = vst [vmem:[#allocation2 + $0x58] sm:$0xff] %v1230_v0  ;;  %245 = vst [vmem:[#allocation2 + $0x60] sm:$0xff] %v1230_v0  ;;  %v339_v19 = vld [vmem:[#allocation7 + $0x70] sm:$0xff]  ;;  %vm335_vm6 = vcmask 917248   ;;  %vm349_vm7 = vcmask 1048448   ;;  %v373_v56 = vld [vmem:[%s1415_s6 + $0x8] sm:$0xff] }
  0x5d   : > { %246 = vst [vmem:[#allocation2 + $0x68] sm:$0xff] %v1230_v0  ;;  %247 = vst [vmem:[#allocation2 + $0x70] sm:$0xff] %v1230_v0  ;;  %v372_v20 = vld [vmem:[%s1415_s6] sm:$0xff]  ;;  %vm452_vm8 = vcmask 31744   ;;  %vm459_vm9 = vcmask 1043456   ;;  %v353_v61 = vld [vmem:[%s1507_s1 + $0x8] sm:$0xff] }
  0x5e   : > { %248 = vst [vmem:[#allocation2 + $0x78] sm:$0xff] %v1230_v0  ;;  %252 = vst.msk [vmem:[#allocation2] sm:$0xff] %vm251_vm0, %v249_v5  ;;  %289 = vrot.lane.b32.xlu1 %v284_v7, %s1233_s12  ;;  %287 = vrot.lane.b32.xlu0 %v283_v8, %s1233_s12  ;;  %v352_v57 = vld [vmem:[%s1507_s1] sm:$0xff]  ;;  %s890_s25 = sshll.u32 %s1411_s11, 6  ;;  %v355_v1 = vld [vmem:[%s1508_s2 + $0x8] sm:$0xff]  ;;  %s909_s12 = sshll.u32 %s1287_s19, 10 }
  0x5f   : > { %253 = vst.msk [vmem:[#allocation2 + $0x8] sm:$0xff] %vm251_vm0, %v250_v6  ;;  %972 = vmatprep.mubr.f32.mxu0 %v372_v20  ;;  %977 = vmatprep.mubr.msk.f32.mxu1 %vm452_vm8, %v352_v57  ;;  %v354_v2 = vld [vmem:[%s1508_s2] sm:$0xff]  ;;  %s230_s21 = scalar_lea.vmem [#allocation9], %s890_s25  ;;  %s1238_s10 = smov [#allocation9]  }
  0x60   : > { %s797_s23 = sshll.u32 %s230_s21, 4  ;;  %s1158_s7 = sshll.u32 %s1238_s10, 4  ;;  %s1457_s23 = int_to_ptr.vmem [resolvable:$true] %s797_s23  ;;  %s1159_s7 = int_to_ptr.vmem [resolvable:$false] %s1158_s7 }
  0x61   : > { %s1154_s19 = scalar_lea.vmem %s1457_s23, 1024  ;;  %s1160_s26 = scalar_lea.vmem %s1159_s7, 2048 }
  0x62   : > { %303 = vrot.lane.b32.xlu1 %v298_v9, %s1234_s13  ;;  %301 = vrot.lane.b32.xlu0 %v297_v10, %s1234_s13  ;;  %p1155_p4 = scmp.ne.s32.totalorder %s1457_s23, %s1154_s19  ;;  %p1161_p10 = scmp.lt.s32.totalorder %s1457_s23, %s1159_s7 }
  0x63   : > { %p1162_p13 = scmp.lt.s32.totalorder %s1160_s26, %s1154_s19 }
  0x64   : > { %p1156_p6 = pnand %p1155_p4, %p1360_p12 }
  0x65   : > { %v356_v11 = vld [vmem:[#allocation2] sm:$0xff]  ;;  %p1163_p3 = por %p1162_p13, %p1161_p10 }
  0x66   : > { %v357_v12 = vld [vmem:[#allocation2 + $0x8] sm:$0xff]  ;;  %317 = vrot.lane.b32.xlu1 %v312_v13, %s1235_s9  ;;  %315 = vrot.lane.b32.xlu0 %v311_v14, %s1235_s9  ;;  %p1157_p8 = pneg %p1156_p6 }
  0x67   : > { %v995_v15 = vpack.c.bf16 %v357_v12, %v356_v11 }
  0x68   : > { %p1164_p7 = pnand %p1163_p3, %p1157_p8 }
  0x69   : > { %996 = vmatprep.subr.bf16.mxu0 %v995_v15 }
  0x6a   : > { %998 = vmatpush3.bf16.msra.mxu0 %v995_v15  ;;  %331 = vrot.lane.b32.xlu1 %v326_v16, %s1236_s28 }
  0x6b   : > { %329 = vrot.lane.b32.xlu0 %v325_v17, %s1236_s28  ;;  %s1462_s28 = scalar_lea.hbm %s1510_s4, %s909_s12 }
  0x6e   : > { %345 = vrot.lane.b32.xlu1 %v340_v18, %s1237_s29 }
  0x6f   : > { %343 = vrot.lane.b32.xlu0 %v339_v19, %s1237_s29  ;;  %s784_s29 = scalar_lea.sflag [#allocation6], %s1411_s11 }
  0xc8   : > { %v274_v21 = vpop.permute.xlu1 %273  ;;  %v260_v22 = vpop.permute.xlu0 %259 }
  0xc9   : > { %280 = vst.msk [vmem:[#allocation2 + $0x20] sm:$0xff] %vm279_vm1, %v274_v21 }
  0xca   : > { %266 = vst.msk [vmem:[#allocation2 + $0x10] sm:$0xff] %vm265_vm2, %v260_v22 }
  0xcc   : > { %v276_v23 = vpop.permute.xlu1 %275  ;;  %v262_v24 = vpop.permute.xlu0 %261 }
  0xcd   : > { %281 = vst.msk [vmem:[#allocation2 + $0x28] sm:$0xff] %vm279_vm1, %v276_v23 }
  0xce   : > { %267 = vst.msk [vmem:[#allocation2 + $0x18] sm:$0xff] %vm265_vm2, %v262_v24 }
  0xd0   : > { %v290_v25 = vpop.permute.xlu1 %289  ;;  %v288_v26 = vpop.permute.xlu0 %287  ;;  %v360_v31 = vld [vmem:[#allocation2 + $0x20] sm:$0xff] }
  0xd1   : > { %295 = vst.msk [vmem:[#allocation2 + $0x38] sm:$0xff] %vm293_vm3, %v290_v25  ;;  %294 = vst.msk [vmem:[#allocation2 + $0x30] sm:$0xff] %vm293_vm3, %v288_v26  ;;  %v358_v27 = vld [vmem:[#allocation2 + $0x10] sm:$0xff] }
  0xd4   : > { %v304_v29 = vpop.permute.xlu1 %303  ;;  %v302_v30 = vpop.permute.xlu0 %301  ;;  %v361_v32 = vld [vmem:[#allocation2 + $0x28] sm:$0xff] }
  0xd5   : > { %v359_v28 = vld [vmem:[#allocation2 + $0x18] sm:$0xff]  ;;  %309 = vst.msk [vmem:[#allocation2 + $0x48] sm:$0xff] %vm307_vm4, %v304_v29  ;;  %308 = vst.msk [vmem:[#allocation2 + $0x40] sm:$0xff] %vm307_vm4, %v302_v30  ;;  %v1003_v34 = vpack.c.bf16 %v361_v32, %v360_v31 }
  0xd6   : > { %v999_v33 = vpack.c.bf16 %v359_v28, %v358_v27 }
  0xd8   : > { %1000 = vmatprep.subr.bf16.mxu0 %v999_v33  ;;  %v318_v35 = vpop.permute.xlu1 %317  ;;  %v316_v36 = vpop.permute.xlu0 %315  ;;  %v362_v37 = vld [vmem:[#allocation2 + $0x30] sm:$0xff]  ;;  %v363_v38 = vld [vmem:[#allocation2 + $0x38] sm:$0xff] }
  0xd9   : > { %1002 = vmatpush3.bf16.msra.mxu0 %v999_v33  ;;  %323 = vst.msk [vmem:[#allocation2 + $0x58] sm:$0xff] %vm321_vm5, %v318_v35  ;;  %322 = vst.msk [vmem:[#allocation2 + $0x50] sm:$0xff] %vm321_vm5, %v316_v36  ;;  %v1007_v39 = vpack.c.bf16 %v363_v38, %v362_v37 }
  0xda   : > { %1004 = vmatprep.subr.bf16.mxu0 %v1003_v34 }
  0xdc   : > { %v332_v40 = vpop.permute.xlu1 %331  ;;  %v364_v42 = vld [vmem:[#allocation2 + $0x40] sm:$0xff]  ;;  %v365_v43 = vld [vmem:[#allocation2 + $0x48] sm:$0xff] }
  0xdd   : > { %1006 = vmatpush3.bf16.msra.mxu0 %v1003_v34  ;;  %v330_v41 = vpop.permute.xlu0 %329  ;;  %337 = vst.msk [vmem:[#allocation2 + $0x68] sm:$0xff] %vm335_vm6, %v332_v40  ;;  %v1011_v44 = vpack.c.bf16 %v365_v43, %v364_v42 }
  0xde   : > { %1008 = vmatprep.subr.bf16.mxu0 %v1007_v39  ;;  %336 = vst.msk [vmem:[#allocation2 + $0x60] sm:$0xff] %vm335_vm6, %v330_v41 }
  0xe0   : > { %v346_v45 = vpop.permute.xlu1 %345  ;;  %v366_v47 = vld [vmem:[#allocation2 + $0x50] sm:$0xff]  ;;  %v367_v48 = vld [vmem:[#allocation2 + $0x58] sm:$0xff] }
  0xe1   : > { %1010 = vmatpush3.bf16.msra.mxu0 %v1007_v39  ;;  %v344_v46 = vpop.permute.xlu0 %343  ;;  %351 = vst.msk [vmem:[#allocation2 + $0x78] sm:$0xff] %vm349_vm7, %v346_v45  ;;  %v1015_v49 = vpack.c.bf16 %v367_v48, %v366_v47 }
  0xe2   : > { %1012 = vmatprep.subr.bf16.mxu0 %v1011_v44  ;;  %350 = vst.msk [vmem:[#allocation2 + $0x70] sm:$0xff] %vm349_vm7, %v344_v46 }
  0xe4   : > { %v369_v51 = vld [vmem:[#allocation2 + $0x68] sm:$0xff] }
  0xe5   : > { %1014 = vmatpush3.bf16.msra.mxu0 %v1011_v44  ;;  %v368_v50 = vld [vmem:[#allocation2 + $0x60] sm:$0xff] }
  0xe6   : > { %1016 = vmatprep.subr.bf16.mxu0 %v1015_v49  ;;  %v1019_v52 = vpack.c.bf16 %v369_v51, %v368_v50 }
  0xe8   : > { %v371_v54 = vld [vmem:[#allocation2 + $0x78] sm:$0xff] }
  0xe9   : > { %1018 = vmatpush3.bf16.msra.mxu0 %v1015_v49  ;;  %v370_v53 = vld [vmem:[#allocation2 + $0x70] sm:$0xff] }
  0xea   : > { %1020 = vmatprep.subr.bf16.mxu0 %v1019_v52  ;;  %v1023_v55 = vpack.c.bf16 %v371_v54, %v370_v53 }
  0xed   : > { %1022 = vmatpush3.bf16.msra.mxu0 %v1019_v52 }
  0xee   : > { %1024 = vmatprep.subr.bf16.mxu0 %v1023_v55 }
  0xf1   : > { %1026 = vmatpush3.bf16.msra.mxu0 %v1023_v55 }
  0xf4   : > { %973 = vmatmul.mubr.f32.vlgmr.msra.gmra.mrb[0].mxu0 %v373_v56 }
 0x1c7   : > { %v974_v58 = vpop.f32.mrb[0].mxu0 }
 0x1c8   : > { %450 = vst [vmem:[#allocation3 + $0x8] sm:$0xff] %v974_v58  ;;  %v440_v59 = vpop.f32.mrb[1].mxu0 }
 0x1c9   : > { %449 = vst [vmem:[#allocation3] sm:$0xff] %v440_v59 }
 0x1cf   : > { %v621_v63 = vld [vmem:[#allocation3 + $0x8] sm:$0xf]  ;;  %v702_v0 = vld [vmem:[#allocation3 + $0xc] sm:$0xf] }
 0x1d0   : > { %v451_v60 = vld [vmem:[#allocation3] sm:$0xf]  ;;  %v540_v62 = vld [vmem:[#allocation3 + $0x4] sm:$0xf] }
 0x1d1   : > { %975 = vmatprep.subr.msk.mxu1 %vm459_vm9, %v451_v60 }
 0x1d2   : > { %976 = vmatpush3.msk.msra.mxu1 %vm459_vm9, %v451_v60 }
 0x1d3   : > { %978 = vmatmul.mubr.msk.f32.vlgmr.msra.gmra.mrb[0].mxu1 %vm452_vm8, %v353_v61  ;;  %980 = vmatprep.subr.msk.mxu1 %vm459_vm9, %v540_v62 }
 0x1d4   : > { %981 = vmatpush3.msk.msra.mxu1 %vm459_vm9, %v540_v62  ;;  %982 = vmatprep.mubr.msk.f32.mxu1 %vm452_vm8, %v352_v57 }
 0x1d5   : > { %985 = vmatprep.subr.msk.mxu1 %vm459_vm9, %v621_v63 }
 0x1d7   : > { %983 = vmatmul.mubr.msk.f32.vlgmr.msra.gmra.mrb[2].mxu1 %vm452_vm8, %v353_v61 }
 0x1d8   : > { %986 = vmatpush3.msk.msra.mxu1 %vm459_vm9, %v621_v63  ;;  %987 = vmatprep.mubr.msk.f32.mxu1 %vm452_vm8, %v352_v57 }
 0x1d9   : > { %990 = vmatprep.subr.msk.mxu1 %vm459_vm9, %v702_v0 }
 0x1db   : > { %988 = vmatmul.mubr.msk.f32.vlgmr.msra.gmra.mrb[4].mxu1 %vm452_vm8, %v353_v61 }
 0x1dc   : > { %991 = vmatpush3.msk.msra.mxu1 %vm459_vm9, %v702_v0  ;;  %992 = vmatprep.mubr.msk.f32.mxu1 %vm452_vm8, %v352_v57 }
 0x1df   : > { %993 = vmatmul.mubr.msk.f32.vlgmr.msra.gmra.mrb[6].mxu1 %vm452_vm8, %v353_v61 }
 0x2a6   : > { %v979_v3 = vpop.f32.mrb[0].mxu1 }
 0x2a7   : > { %v535_v4 = vadd.f32 %v979_v3, %v355_v1  ;;  %v529_v5 = vpop.f32.mrb[1].mxu1 }
 0x2a8   : > { %v530_v6 = vadd.f32 %v529_v5, %v354_v2 }
 0x2a9   : > { %539 = vst [vmem:[%s230_s21 + $0x8] sm:$0xff] %v535_v4 }
 0x2aa   : > { %538 = vst [vmem:[%s230_s21] sm:$0xff] %v530_v6  ;;  %v984_v7 = vpop.f32.mrb[2].mxu1 }
 0x2ab   : > { %v616_v8 = vadd.f32 %v984_v7, %v355_v1  ;;  %v610_v9 = vpop.f32.mrb[3].mxu1 }
 0x2ac   : > { %v611_v10 = vadd.f32 %v610_v9, %v354_v2 }
 0x2ad   : > { %620 = vst [vmem:[%s230_s21 + $0x18] sm:$0xff] %v616_v8 }
 0x2ae   : > { %619 = vst [vmem:[%s230_s21 + $0x10] sm:$0xff] %v611_v10  ;;  %v989_v11 = vpop.f32.mrb[4].mxu1 }
 0x2af   : > { %v697_v12 = vadd.f32 %v989_v11, %v355_v1  ;;  %v691_v13 = vpop.f32.mrb[5].mxu1 }
 0x2b0   : > { %v692_v14 = vadd.f32 %v691_v13, %v354_v2 }
 0x2b1   : > { %701 = vst [vmem:[%s230_s21 + $0x28] sm:$0xff] %v697_v12 }
 0x2b2   : > { %700 = vst [vmem:[%s230_s21 + $0x20] sm:$0xff] %v692_v14  ;;  %v994_v15 = vpop.f32.mrb[6].mxu1 }
 0x2b3   : > { %v778_v16 = vadd.f32 %v994_v15, %v355_v1  ;;  %v772_v17 = vpop.f32.mrb[7].mxu1 }
 0x2b4   : > { %v773_v18 = vadd.f32 %v772_v17, %v354_v2 }
 0x2b5   : > { %782 = vst [vmem:[%s230_s21 + $0x38] sm:$0xff] %v778_v16 }
 0x2b6   : > { %781 = vst [vmem:[%s230_s21 + $0x30] sm:$0xff] %v773_v18 }
 0x2b7   : > { %1167 = shalt.err (!%p1164_p7)
}
 0x2b8   : > { %s1168_s8 = scalar_lea.hbm %s1462_s28, 1024  ;;  %s1172_s20 = scalar_lea.hbm %s1510_s4, 2048 }
 0x2b9   : > { %p1169_p9 = scmp.ne.s32.totalorder %s1462_s28, %s1168_s8  ;;  %p1173_p5 = scmp.lt.u32.totalorder %s1462_s28, %s1510_s4 }
 0x2ba   : > { %p1174_p11 = scmp.lt.u32.totalorder %s1172_s20, %s1168_s8  ;;  %p1176_p4 = scmp.lt.u32.totalorder %s1168_s8, %s1462_s28 }
 0x2bb   : > { %p1170_p1 = pnand %p1169_p9, %p1360_p12 }
 0x2bc   : > { %p1175_p2 = por %p1174_p11, %p1173_p5 }
 0x2bd   : > { %p1171_p0 = pneg %p1170_p1 }
 0x2be   : > { %p1177_p6 = por %p1176_p4, %p1175_p2 }
 0x2c0   : > { %p1178_p8 = pnand %p1177_p6, %p1171_p0 }
 0x2c2   : > { %1181 = shalt.err (!%p1178_p8)
}
 0x2c3   : > { %s1239_s21 = smov 128   ;;  %s1240_s12 = smov 8  }
 0x2c4   : > { %1033 = dma.vmem_to_hbm [thread:$0]  (%p1360_p12), %s1457_s23, 1024, %s1462_s28, %s784_s29, %s1239_s21, %s1239_s21, %s1240_s12  }
 0x2c5 PF: > { %s812_s13 = sand.u32 1, %s1212_s15   ;;  %p1525_p10 = scmp.ne.s32.totalorder %s1515_s22, 0 }
 0x2c6   : > { %p1526_p13 = scmp.ge.s32.totalorder %s1224_s18, 2  ;;  %s813_s9 = scalar_lea.sflag [#allocation6], %s812_s13 }
 0x2c8   : > { %p1044_p3 = pnand %p1526_p13, %p1525_p10 }
 0x2ca   : > { %1207 = dma.done.wait (!%p1044_p3), %s813_s9, 1024  }
 0x2cb   : > { %1209 = vsyncadd (!%p1044_p3), %s813_s9, 4294966272  ;;  %p18_p7 = scmp.ge.s32.totalorder %s1322_s27, 4   ;;  %s1527_s15 = smov %s1216_s16 }
 0x2cc   : > { %s1528_s16 = smov %s1220_s17  ;;  %s1529_s17 = smov %s1356_s24 }
 0x2cd   : > { %s1530_s18 = smov %s1322_s27  ;;  %20 = sbr.rel (!%p18_p7) target bundleno = 6 (0x6), region = 92 }
 0x2d4   :  { %818 = vsyncpa [#allocation5], 1 }
 0x2d5   :  { %820 = vsyncpa [#allocation5 + $0x1], 1 }
 0x2d6   :  { %821 = vsyncpa [#allocation8], 1 }
 0x2d7   :  { %822 = vsyncpa [#allocation6], 1 }
 0x2d8   :  { %824 = vsyncpa [#allocation6 + $0x1], 1 }

</bundles_post_ra>
